<compile_context>
chip_gen: v6e
topology: v6e:2x2x1
jax: 0.10.0
libtpu: 0.0.40
codegen_flags: <defaults>
</compile_context>

<pallas_src>
import jax
import jax.numpy as jnp
from jax.experimental import pallas as pl
from jax.experimental.pallas import tpu as pltpu

_TILE_BUDGET_BYTES = 2 << 20   # ~2 MiB of x per tile (2*x + 2*out ~= 8 MiB VMEM)
_MIN_SPLIT_BYTES = 4 << 20     # above this total size, force >=2 grid steps (v7x 2 TCs)


def affine_kernel(gb_ref, x_ref, o_ref):
    # gb_ref: (rows, 2) f32 = [gamma | beta]; x_ref / o_ref: (rows, lanes).
    g = gb_ref[:, 0:1]
    b = gb_ref[:, 1:2]
    # Single fused multiply-add per vreg; row->lane broadcast is free VPU work.
    o_ref[...] = (x_ref[...] * g + b).astype(o_ref.dtype)


def _round_up(v, m):
    return -(-v // m) * m


def _round_down(v, m):
    return (v // m) * m


def affine(x, gamma, beta):
    """x: (N, C, H, W) f32/bf16; gamma, beta: (1, C, 1, 1) (PyTorch param shape)."""
    N, C, H, W = x.shape
    R, L = N * C, H * W
    itemsize = jnp.dtype(x.dtype).itemsize
    row_mult = 8 * (4 // itemsize)          # sublane packing: 8 for f32, 16 for bf16

    # Lane-dense view: one row per (n, c) pair, lanes = flattened spatial dims.
    x2 = x.reshape(R, L)

    # Guard lane density: pad trailing dim to a multiple of 128 (>=128).
    L_pad = max(128, _round_up(L, 128))
    if L_pad != L:
        x2 = jnp.pad(x2, ((0, 0), (0, L_pad - L)))

    # Per-row [gamma, beta] table, f32 compute precision (tiny: R x 2).
    g_rows = jnp.broadcast_to(gamma.reshape(1, C), (N, C)).reshape(R)
    b_rows = jnp.broadcast_to(beta.reshape(1, C), (N, C)).reshape(R)
    gb = jnp.stack([g_rows, b_rows], axis=1).astype(jnp.float32)

    # ---- byte-budgeted tiling -------------------------------------------
    row_bytes_full = L_pad * itemsize
    if row_mult * row_bytes_full <= _TILE_BUDGET_BYTES:
        block_lanes = L_pad                                  # no lane tiling needed
    else:                                                    # huge H*W: tile lanes too
        block_lanes = max(
            128, _round_down(_TILE_BUDGET_BYTES // (row_mult * itemsize), 128))

    total_bytes = R * row_bytes_full
    if total_bytes < _MIN_SPLIT_BYTES and block_lanes == L_pad:
        block_rows = R                                       # single step, full extents
    else:
        block_rows = min(R, max(row_mult, _round_down(
            _TILE_BUDGET_BYTES // (block_lanes * itemsize), row_mult)))

    grid = (pl.cdiv(R, block_rows), pl.cdiv(L_pad, block_lanes))

    out2 = pl.pallas_call(
        affine_kernel,
        out_shape=jax.ShapeDtypeStruct((R, L_pad), x.dtype),
        grid=grid,
        in_specs=[
            pl.BlockSpec((block_rows, 2), lambda i, j: (i, 0)),            # gamma|beta
            pl.BlockSpec((block_rows, block_lanes), lambda i, j: (i, j)),  # x
        ],
        out_specs=pl.BlockSpec((block_rows, block_lanes), lambda i, j: (i, j)),
        compiler_params=pltpu.CompilerParams(
            dimension_semantics=("parallel", "parallel")),
        # TODO(synk): add input_output_aliases={1: 0} when callers can donate x's
        # HBM buffer (kept pure here to match the module's functional semantics).
    )(gb, x2)

    if L_pad != L:
        out2 = out2[:, :L]
    return out2.reshape(N, C, H, W)


if __name__ == "__main__":
    key = jax.random.PRNGKey(0)
    kx, kg, kb = jax.random.split(key, 3)

    N, C, H, W = 2, 3, 16, 16                        # module hard-codes C=3
    x = jax.random.normal(kx, (N, C, H, W), dtype=jnp.float32)

    # Module init is ones/zeros with shape (1, 3, 1, 1); use deterministic
    # non-trivial values so the check is meaningful.
    gamma = (1.0 + 0.1 * jax.random.normal(kg, (C,), dtype=jnp.float32)).reshape(1, C, 1, 1)
    beta = (0.1 * jax.random.normal(kb, (C,), dtype=jnp.float32)).reshape(1, C, 1, 1)

    # f32 path (H*W = 256, already a 128-multiple -> no padding).
    out = jax.block_until_ready(affine(x, gamma, beta))
    ref = gamma * x + beta
    assert out.shape == (N, C, H, W)
    assert jnp.allclose(out, ref, atol=1e-6, rtol=1e-6)

    # Small-feature-map path (H*W = 64 < 128 -> exercises the lane-pad branch).
    xs = x[:, :, :8, :8]
    out_s = jax.block_until_ready(affine(xs, gamma, beta))
    ref_s = gamma * xs + beta
    assert jnp.allclose(out_s, ref_s, atol=1e-6, rtol=1e-6)

    # bf16 I/O path (halved HBM traffic; f32 compute, bf16 store).
    xb = x.astype(jnp.bfloat16)
    out_b = jax.block_until_ready(affine(xb, gamma, beta))
    ref_b = (gamma * xb.astype(jnp.float32) + beta).astype(jnp.bfloat16)
    assert out_b.dtype == jnp.bfloat16
    assert jnp.allclose(out_b.astype(jnp.float32), ref_b.astype(jnp.float32),
                        atol=1e-2, rtol=1e-2)

    print("KERNEL_OK")
</pallas_src>

<mosaic_0001>
module attributes {stable_mosaic.version = 11 : i64} {
  func.func @affine_kernel(%arg0: i32, %arg1: i32, %arg2: memref<6x2xf32, #tpu.memory_space<vmem>>, %arg3: memref<6x256xf32, #tpu.memory_space<vmem>>, %arg4: memref<6x256xf32, #tpu.memory_space<vmem>>) attributes {dimension_semantics = [#tpu.dimension_semantics<parallel>, #tpu.dimension_semantics<parallel>], iteration_bounds = array<i64: 1, 1>, scalar_prefetch = 0 : i64, scratch_operands = 0 : i64, tpu.core_type = #tpu.core_type<tc>, window_params = [{transform_indices = @transform_0, window_bounds = array<i64: 6, 2>}, {transform_indices = @transform_1, window_bounds = array<i64: 6, 256>}, {transform_indices = @transform_2, window_bounds = array<i64: 6, 256>}]} {
    %c0 = arith.constant 0 : index
    %c0_0 = arith.constant 0 : index
    %0 = vector.load %arg2[%c0, %c0_0] : memref<6x2xf32, #tpu.memory_space<vmem>>, vector<6x1xf32>
    %c0_1 = arith.constant 0 : index
    %c1 = arith.constant 1 : index
    %1 = vector.load %arg2[%c0_1, %c1] : memref<6x2xf32, #tpu.memory_space<vmem>>, vector<6x1xf32>
    %c0_2 = arith.constant 0 : index
    %c0_3 = arith.constant 0 : index
    %2 = vector.load %arg3[%c0_2, %c0_3] : memref<6x256xf32, #tpu.memory_space<vmem>>, vector<6x256xf32>
    %3 = vector.broadcast %0 : vector<6x1xf32> to vector<6x256xf32>
    %4 = arith.mulf %2, %3 : vector<6x256xf32>
    %5 = vector.broadcast %1 : vector<6x1xf32> to vector<6x256xf32>
    %6 = arith.addf %4, %5 : vector<6x256xf32>
    %c0_4 = arith.constant 0 : index
    %c0_5 = arith.constant 0 : index
    %7 = vector.load %arg4[%c0_4, %c0_5] : memref<6x256xf32, #tpu.memory_space<vmem>>, vector<6x256xf32>
    tpu.vector_store %arg4[%c0_4, %c0_5], %6 {strides = array<i32>} : memref<6x256xf32, #tpu.memory_space<vmem>>, vector<6x256xf32>,
    return
  }
  func.func @transform_0(%arg0: i32, %arg1: i32) -> (i32, i32) {
    %c0_i32 = arith.constant 0 : i32
    %c0_i32_0 = arith.constant 0 : i32
    return %arg0, %c0_i32 : i32, i32
  }
  func.func @transform_1(%arg0: i32, %arg1: i32) -> (i32, i32) {
    %c0_i32 = arith.constant 0 : i32
    return %arg0, %arg1 : i32, i32
  }
  func.func @transform_2(%arg0: i32, %arg1: i32) -> (i32, i32) {
    %c0_i32 = arith.constant 0 : i32
    return %arg0, %arg1 : i32, i32
  }
}

</mosaic_0001>

<bundles_post_ra>
// kernel: tpu_custom_call.1
= control target key start
LH: loop header
LB: loop body
LE: loop exit
PB: predicated region body
PF: predicated region fallthrough
CT: control target
= control target key end

     0   :  { %7 = vsyncpa [#allocation3], 0  ;;  %s135_s0 = inlined_call_operand.vmem [shape: f32[6,2], index: 0, kind: input, shape index: {}]   ;;  %s136_s1 = inlined_call_operand.hbm [shape: f32[6,256], index: 1, kind: input, shape index: {}]   ;;  %s137_s2 = inlined_call_operand.hbm [shape: f32[6,256], index: 2, kind: output, shape index: {}]  }
   0x1   :  { %8 = vsyncpa [#allocation4], 0  ;;  %s107_s9 = smov [#allocation2]  }
   0x2   :  { %s17_s10 = sshll.u32 %s107_s9, 4  ;;  %s18_s10 = int_to_ptr.vmem [resolvable:$true] %s17_s10 }
   0x3   :  { %s71_s11 = scalar_lea.vmem %s18_s10, 256  ;;  %p76_p1 = scmp.lt.s32.totalorder %s18_s10, %s18_s10 }
   0x4   :  { %p72_p0 = scmp.ne.s32.totalorder %s18_s10, %s71_s11  ;;  %p77_p2 = scmp.lt.s32.totalorder %s71_s11, %s71_s11 }
   0x6   :  { %p78_p3 = por %p77_p2, %p76_p1 }
   0x8   :  { %p79_p4 = pnand %p78_p3, %p72_p0 }
   0xa   :  { %82 = shalt.err (!%p79_p4)
}
   0xb   :  { %20 = dma.hbm_to_vmem [thread:$0]  %s136_s1, 256, %s18_s10, [#allocation3]  }
   0xc   :  { %103 = dma.done.wait [#allocation3], 256  }
   0xd   :  { %104 = vsyncadd [#allocation3], 4294967040  ;;  %v108_v0 = vmov 0   ;;  %v24_v1 = vld [vmem:[%s135_s0] sm:$0x3f]  ;;  %v109_v2 = vmov 1  }
   0xe   :  { %61 = vset.pattern.permute.xlu0 %v108_v0  ;;  %v25_v4 = vld [vmem:[#allocation2] sm:$0x3f]  ;;  %v26_v5 = vld [vmem:[#allocation2 + $0x8] sm:$0x3f]  ;;  %s110_s16 = smov [#allocation5]  }
   0xf   :  { %29 = vperm.xlu0 %61, %v24_v1   ;;  %s48_s17 = sshll.u32 %s110_s16, 4  ;;  %s49_s17 = int_to_ptr.vmem [resolvable:$true] %s48_s17 }
  0x10   :  { %s83_s1 = scalar_lea.vmem %s49_s17, 256  ;;  %p88_p6 = scmp.lt.s32.totalorder %s49_s17, %s49_s17 }
  0x11   :  { %p84_p5 = scmp.ne.s32.totalorder %s49_s17, %s83_s1  ;;  %p89_p7 = scmp.lt.s32.totalorder %s83_s1, %s83_s1 }
  0x13   :  { %62 = vset.pattern.permute.xlu0 %v109_v2  ;;  %p90_p8 = por %p89_p7, %p88_p6 }
  0x14   :  { %35 = vperm.xlu0 %62, %v24_v1  }
  0x15   :  { %p91_p9 = pnand %p90_p8, %p84_p5 }
  0x8a   :  { %v30_v3 = vpop.permute.xlu0 %29 }
  0x8b   :  { %v32_v6 = vmul.f32 %v30_v3, %v25_v4  ;;  %v33_v7 = vmul.f32 %v30_v3, %v26_v5 }
  0x8f   :  { %v36_v8 = vpop.permute.xlu0 %35 }
  0x90   :  { %v38_v9 = vadd.f32 %v36_v8, %v32_v6  ;;  %v39_v10 = vadd.f32 %v36_v8, %v33_v7 }
  0x92   :  { %40 = vst [vmem:[#allocation5] sm:$0x3f] %v38_v9  ;;  %41 = vst [vmem:[#allocation5 + $0x8] sm:$0x3f] %v39_v10 }
  0x93   :  { %94 = shalt.err (!%p91_p9)
}
  0x94   :  { %51 = dma.vmem_to_hbm [thread:$0]  %s49_s17, 256, %s137_s2, [#allocation4]  }
  0x95   :  { %105 = dma.done.wait [#allocation4], 256  }
  0x96   :  { %106 = vsyncadd [#allocation4], 4294967040 }
  0x97   :  { %55 = vsyncpa [#allocation3], 1 }
  0x98   :  { %56 = vsyncpa [#allocation4], 1 }

</bundles_post_ra>
